<compile_context>
chip_gen: v6e
topology: v6e:2x2x1
jax: 0.10.0
libtpu: 0.0.40
codegen_flags: <defaults>
</compile_context>

<pallas_src>
import jax
import jax.numpy as jnp
from jax.experimental import pallas as pl
from jax.experimental.pallas import tpu as pltpu


def _copy_kernel(z_ref, o_ref):
    # (TB, D) -> (TB, D): lane/sublane-dense copy, unmasked full vector stores.
    o_ref[...] = z_ref[...]


def _pick_tile_rows(B, D, dtype):
    """Rows per tile: ~4 MiB per tile (in+out each double-buffered => ~16 MiB
    of VMEM worst case), capped at 1024 rows (past the measured roofline knee),
    and a multiple of 8 whenever the tile doesn't cover the whole batch."""
    bytes_per_row = max(1, D * jnp.dtype(dtype).itemsize)
    max_rows = max(8, (4 * 1024 * 1024) // bytes_per_row)
    tb = min(B, 1024, max_rows)
    if tb < B:
        tb = max(8, (tb // 8) * 8)  # keep (8, ·) tiling rule for partial blocks
    return tb


@jax.jit
def _dummy_mapping_impl(z):
    B, D = z.shape
    tb = _pick_tile_rows(B, D, z.dtype)
    out = pl.pallas_call(
        _copy_kernel,
        out_shape=jax.ShapeDtypeStruct((B, D), z.dtype),
        grid=(pl.cdiv(B, tb),),
        in_specs=[pl.BlockSpec((tb, D), lambda i: (i, 0))],
        out_specs=pl.BlockSpec((tb, D), lambda i: (i, 0)),
        compiler_params=pltpu.CompilerParams(
            dimension_semantics=("parallel",)),
    )(z)
    # unsqueeze(1) is a metadata-only reshape here (free), done outside the
    # kernel so the kernel's output tile stays lane/sublane dense.
    return out.reshape(B, 1, D)


def dummy_mapping(z, c=None, **kwargs):
    """Pallas implementation of DummyMapping.forward: returns z.unsqueeze(1).

    `c` and kwargs are ignored (matching the PyTorch module) and never enter
    the traced computation.
    """
    del c, kwargs
    return _dummy_mapping_impl(z)


if __name__ == "__main__":
    key = jax.random.PRNGKey(0)
    kz, kc = jax.random.split(key)

    B, D = 2, 32  # small latent batch, consistent with a mapping-net input
    z = jax.random.normal(kz, (B, D), dtype=jnp.float32)
    c = jax.random.normal(kc, (B, 4), dtype=jnp.float32)  # unused, as in module

    out = dummy_mapping(z, c)
    out = jax.block_until_ready(out)

    ref = jnp.expand_dims(z, 1)
    assert out.shape == (B, 1, D), out.shape
    assert out.dtype == z.dtype
    assert jnp.array_equal(out, ref)

    print("KERNEL_OK")
</pallas_src>

<mosaic_0001>
module attributes {stable_mosaic.version = 11 : i64} {
  func.func @_copy_kernel(%arg0: i32, %arg1: memref<2x32xf32, #tpu.memory_space<vmem>>, %arg2: memref<2x32xf32, #tpu.memory_space<vmem>>) attributes {dimension_semantics = [#tpu.dimension_semantics<parallel>], iteration_bounds = array<i64: 1>, scalar_prefetch = 0 : i64, scratch_operands = 0 : i64, tpu.core_type = #tpu.core_type<tc>, window_params = [{transform_indices = @transform_0, window_bounds = array<i64: 2, 32>}, {transform_indices = @transform_1, window_bounds = array<i64: 2, 32>}]} {
    %c0 = arith.constant 0 : index
    %c0_0 = arith.constant 0 : index
    %0 = vector.load %arg1[%c0, %c0_0] : memref<2x32xf32, #tpu.memory_space<vmem>>, vector<2x32xf32>
    %c0_1 = arith.constant 0 : index
    %c0_2 = arith.constant 0 : index
    %1 = vector.load %arg2[%c0_1, %c0_2] : memref<2x32xf32, #tpu.memory_space<vmem>>, vector<2x32xf32>
    tpu.vector_store %arg2[%c0_1, %c0_2], %0 {strides = array<i32>} : memref<2x32xf32, #tpu.memory_space<vmem>>, vector<2x32xf32>,
    return
  }
  func.func @transform_0(%arg0: i32) -> (i32, i32) {
    %c0_i32 = arith.constant 0 : i32
    %c0_i32_0 = arith.constant 0 : i32
    return %arg0, %c0_i32 : i32, i32
  }
  func.func @transform_1(%arg0: i32) -> (i32, i32) {
    %c0_i32 = arith.constant 0 : i32
    %c0_i32_0 = arith.constant 0 : i32
    return %arg0, %c0_i32 : i32, i32
  }
}

</mosaic_0001>

<bundles_post_ra>
// kernel: _dummy_mapping_impl.1
= control target key start
LH: loop header
LB: loop body
LE: loop exit
PB: predicated region body
PF: predicated region fallthrough
CT: control target
= control target key end

     0   :  { %6 = vsyncpa [#allocation3], 0  ;;  %s103_s0 = inlined_call_operand.hbm [shape: f32[2,32], index: 0, kind: input, shape index: {}]   ;;  %s104_s1 = inlined_call_operand.hbm [shape: f32[2,32], index: 1, kind: output, shape index: {}]  }
   0x1   :  { %7 = vsyncpa [#allocation4], 0  ;;  %s85_s6 = smov [#allocation2]  }
   0x2   :  { %s14_s7 = sshll.u32 %s85_s6, 4  ;;  %s15_s7 = int_to_ptr.vmem [resolvable:$true] %s14_s7 }
   0x3   :  { %s49_s8 = scalar_lea.vmem %s15_s7, 32  ;;  %p54_p1 = scmp.lt.s32.totalorder %s15_s7, %s15_s7 }
   0x4   :  { %p50_p0 = scmp.ne.s32.totalorder %s15_s7, %s49_s8  ;;  %p55_p2 = scmp.lt.s32.totalorder %s49_s8, %s49_s8 }
   0x6   :  { %p56_p3 = por %p55_p2, %p54_p1 }
   0x8   :  { %p57_p4 = pnand %p56_p3, %p50_p0 }
   0xa   :  { %60 = shalt.err (!%p57_p4)
}
   0xb   :  { %17 = dma.hbm_to_vmem [thread:$0]  %s103_s0, 32, %s15_s7, [#allocation3]  }
   0xc   :  { %81 = dma.done.wait [#allocation3], 32  }
   0xd   :  { %82 = vsyncadd [#allocation3], 4294967264  ;;  %s86_s11 = smov [#allocation5]   ;;  %vm22_vm0 = vcmask 254976   ;;  %v21_v0 = vld [vmem:[#allocation2] sm:$0x3] }
   0xe   :  { %s30_s12 = sshll.u32 %s86_s11, 4  ;;  %23 = vst.msk [vmem:[#allocation5] sm:$0x3] %vm22_vm0, %v21_v0  ;;  %s31_s12 = int_to_ptr.vmem [resolvable:$true] %s30_s12 }
   0xf   :  { %s61_s13 = scalar_lea.vmem %s31_s12, 32  ;;  %p66_p6 = scmp.lt.s32.totalorder %s31_s12, %s31_s12 }
  0x10   :  { %p62_p5 = scmp.ne.s32.totalorder %s31_s12, %s61_s13  ;;  %p67_p7 = scmp.lt.s32.totalorder %s61_s13, %s61_s13 }
  0x12   :  { %p68_p8 = por %p67_p7, %p66_p6 }
  0x14   :  { %p69_p9 = pnand %p68_p8, %p62_p5 }
  0x16   :  { %72 = shalt.err (!%p69_p9)
}
  0x17   :  { %33 = dma.vmem_to_hbm [thread:$0]  %s31_s12, 32, %s104_s1, [#allocation4]  }
  0x18   :  { %83 = dma.done.wait [#allocation4], 32  }
  0x19   :  { %84 = vsyncadd [#allocation4], 4294967264 }
  0x1a   :  { %37 = vsyncpa [#allocation3], 1 }
  0x1b   :  { %38 = vsyncpa [#allocation4], 1 }

</bundles_post_ra>
